<compile_context>
chip_gen: v7x
topology: tpu7x:2x2x1
jax: 0.10.0
libtpu: 0.0.40
codegen_flags: <defaults>
</compile_context>

<pallas_src>
import jax
import jax.numpy as jnp
import numpy as np
from jax.experimental import pallas as pl
from jax.experimental.pallas import tpu as pltpu


# --------------------------------------------------------------------------
# Pallas kernel: Bt batches of decoder head + norm_targets + masked MSE
# --------------------------------------------------------------------------
def swinmsp_loss_kernel(x_ref, zt_ref, mask_ref, wrbT_ref, wdec_ref,
                        dzb_ref, a2_ref, stats_ref, out_ref):
    f32 = jnp.float32
    bf16 = jnp.bfloat16
    bt, p2, c = x_ref.shape                  # c == NP (num_patches), lane axis
    inv_p2 = 1.0 / p2

    wrbT = wrbT_ref[...]                     # (L,  NP) bf16
    wdec = wdec_ref[...]                     # (P2, D ) bf16
    dzb = dzb_ref[...]                       # (P2, NP) f32  (brb & bdec folded)
    a2 = a2_ref[...]                         # (2P2, 2P2) f32 0/1 w-axis band
    rcnt = stats_ref[0]                      # (P2, C) f32: 1/count
    k1 = stats_ref[1]                        # (P2, C) f32: 1/(count-1)

    # Boundary masks for the C-axis (lane) 5-tap shift-adds.  Hoisted out of
    # the batch loop (JAX does not CSE broadcasts/iotas).
    lane = jax.lax.broadcasted_iota(jnp.int32, (2 * p2, c), 1)
    taps = []
    for d in (-2, -1, 1, 2):
        taps.append(((-d) % c, ((lane + d) >= 0) & ((lane + d) < c)))

    acc = jnp.zeros((1, c), dtype=f32)
    for b in range(bt):                      # small static unroll over Bt
        xb = x_ref[b]                        # (P2, C) f32

        # ---- decoder head: all MXU N dims lane-dense (= NP) ----
        rt = jnp.dot(zt_ref[b], wrbT, preferred_element_type=f32)        # (D, NP)
        dz = jnp.dot(wdec, rt.astype(bf16),
                     preferred_element_type=f32) + dzb                   # (P2, NP)

        # ---- norm_targets(x, 5): separable 5x5 pool over (w, C), all f32 ----
        xs = jnp.concatenate([xb, xb * xb], axis=0)                      # (2P2, C)
        pooled = xs
        for shift, valid in taps:            # C-axis 5-tap via lane rolls
            pooled = pooled + jnp.where(
                valid, pltpu.roll(xs, shift=shift, axis=1), 0.0)
        s12 = jnp.dot(a2, pooled, preferred_element_type=f32)            # (2P2, C)
        s1 = s12[:p2]                        # window sum of x
        s2 = s12[p2:]                        # window sum of x^2
        mean = s1 * rcnt
        var = jnp.maximum((s2 - s1 * mean) * k1, 0.0)
        xn = (xb - mean) * jax.lax.rsqrt(var + 1e-6)                     # (P2, C)

        # ---- F.mse_loss(...,'none').mean(dim=1), mask-weighted partial ----
        err = (xn - dz) ** 2                                             # (P2, NP)
        lrow = jnp.sum(err, axis=0, keepdims=True) * inv_p2              # (1, NP)
        acc = acc + lrow * mask_ref[b]                                   # (1, NP)

    out_ref[...] = acc                       # lane-dense per-step partial row


# --------------------------------------------------------------------------
# Wrapper: layout plumbing, pool constants, pallas_call over batch groups
# --------------------------------------------------------------------------
def swin_msp_forward(x, z_enc, mask, Wrb, brb, Wdec, bdec, in_chans,
                     *, block_batch=None):
    B, H, W, C = x.shape
    P2 = H * W
    NP, L = Wrb.shape
    P2d, D = Wdec.shape
    assert P2d == P2 and NP == C

    f32, bf16 = jnp.float32, jnp.bfloat16

    # batches per grid step (amortize ~0.35us/step pipeline overhead)
    if block_batch is None:
        bt = 1
        for cand in range(1, min(B, 8) + 1):
            if B % cand == 0:
                bt = cand
    else:
        bt = int(block_batch)
    if B % bt != 0:
        raise ValueError(f"block_batch={bt} must divide batch={B}")
    G = B // bt

    # lane-dense layout: num_patches (= C) on the lane axis everywhere
    x_k = x.reshape(B, P2, C).astype(f32)                      # (B, P2, NP)
    zt_k = jnp.swapaxes(z_enc[:, 0], 1, 2).astype(bf16)        # (B, D,  L )
    mask_k = mask.astype(f32).reshape(B, 1, NP)                # (B, 1,  NP)
    wrbT_k = jnp.transpose(Wrb).astype(bf16)                   # (L,  NP)
    wdec_k = Wdec.astype(bf16)                                 # (P2, D )
    # fold both linear biases into a single (P2, NP) slab:
    #   dz = Wdec @ (z^T @ Wrb^T) + [ bdec[:,None] + rowsum(Wdec) * brb[None,:] ]
    dz_bias = (bdec.astype(f32)[:, None]
               + jnp.sum(Wdec.astype(f32), axis=1)[:, None]
               * brb.astype(f32)[None, :])                     # (P2, NP) f32

    # separable 5x5 avg_pool2d of norm_targets over the (w, C) plane per (b, h):
    # w-axis as a tiny band matrix (block-diag for the [x ; x^2] stack),
    # C-axis done in-kernel with lane rolls.
    half = 5 // 2
    fi = np.arange(P2)
    row, col = fi // W, fi % W
    A = ((row[:, None] == row[None, :]) &
         (np.abs(col[:, None] - col[None, :]) <= half)).astype(np.float32)
    A2 = np.zeros((2 * P2, 2 * P2), np.float32)
    A2[:P2, :P2] = A
    A2[P2:, P2:] = A
    cnt_w = A.sum(axis=1)                                      # (P2,) valid w taps
    ci = np.arange(C)
    cnt_c = (np.abs(ci[:, None] - ci[None, :]) <= half).sum(axis=1).astype(np.float32)
    cnt = cnt_w[:, None] * cnt_c[None, :]                      # (P2, C)
    if cnt.min() <= 1.0:
        raise ValueError("norm_targets pooling window has <2 valid elements; "
                         "Bessel factor cnt/(cnt-1) undefined (need W>=2, C>=2)")
    stats = np.stack([1.0 / cnt, 1.0 / (cnt - 1.0)]).astype(np.float32)  # (2,P2,C)

    a2_k = jnp.asarray(A2, dtype=f32)        # exact 0/1; pool path stays f32
    stats_k = jnp.asarray(stats)

    def _const(shape):                       # whole array, fetched once
        n = len(shape)
        return pl.BlockSpec(shape, lambda g, _n=n: (0,) * _n)

    grid_spec = pltpu.PrefetchScalarGridSpec(
        num_scalar_prefetch=0,
        grid=(G,),
        in_specs=[
            pl.BlockSpec((bt, P2, C), lambda g: (g, 0, 0)),    # x slice
            pl.BlockSpec((bt, D, L), lambda g: (g, 0, 0)),     # z^T slice
            pl.BlockSpec((bt, 1, NP), lambda g: (g, 0, 0)),    # mask rows
            _const((L, NP)),                                   # Wrb^T
            _const((P2, D)),                                   # Wdec
            _const((P2, NP)),                                  # folded biases
            _const((2 * P2, 2 * P2)),                          # block-diag A
            _const((2, P2, C)),                                # [1/cnt ; 1/(cnt-1)]
        ],
        out_specs=pl.BlockSpec((None, 1, NP), lambda g: (g, 0, 0)),
    )

    per_step = pl.pallas_call(
        swinmsp_loss_kernel,
        out_shape=jax.ShapeDtypeStruct((G, 1, NP), jnp.float32),
        grid_spec=grid_spec,
        compiler_params=pltpu.CompilerParams(
            dimension_semantics=("parallel",),        # batch groups independent
            vmem_limit_bytes=32 * 1024 * 1024,        # fits v7x, raises v5e default
        ),
    )(x_k, zt_k, mask_k, wrbT_k, wdec_k, dz_bias, a2_k, stats_k)

    # tiny scalar combine of per-step lane-dense partials (pure glue)
    return jnp.sum(per_step) / (jnp.sum(mask_k) + 1e-5) / in_chans


# --------------------------------------------------------------------------
# Pure-JAX f32 reference (mirrors the PyTorch forward exactly) for validation
# --------------------------------------------------------------------------
def _norm_targets_ref(t, ps):
    pad = ps // 2

    def pool_sum(a):
        return jax.lax.reduce_window(
            a, 0.0, jax.lax.add, (1, 1, ps, ps), (1, 1, 1, 1),
            padding=((0, 0), (0, 0), (pad, pad), (pad, pad)))

    s = pool_sum(t)
    s2 = pool_sum(t * t)
    cnt = pool_sum(jnp.ones_like(t))
    mean = s / cnt
    var = (s2 / cnt - mean ** 2) * (cnt / (cnt - 1.0))
    var = jnp.maximum(var, 0.0)
    return (t - mean) / jnp.sqrt(var + 1e-6)


def reference_forward(x, z_enc, mask, Wrb, brb, Wdec, bdec, in_chans):
    B, h, w, C = x.shape
    z = z_enc[:, 0]
    z = jnp.swapaxes(z, 1, 2)              # (B, D, L)
    z = z @ Wrb.T + brb                    # (B, D, NP)
    z = jnp.swapaxes(z, 1, 2)              # (B, NP, D)
    z = z @ Wdec.T + bdec                  # (B, NP, P2)
    z = jnp.swapaxes(z, 1, 2)              # (B, P2, NP)
    xn = _norm_targets_ref(x, 5)
    xf = xn.reshape(B, h * w, C)
    lr = ((xf - z) ** 2).mean(axis=1)      # (B, NP)
    return (lr * mask).sum() / (mask.sum() + 1e-5) / in_chans


# --------------------------------------------------------------------------
if __name__ == "__main__":
    # Small synthetic config consistent with the module's shape arithmetic:
    #   x: (B, patch_size, patch_size, num_patches)
    #   linear_rollback: num_patches / 2**(num_layers-1) -> num_patches
    #   linear_decoder:  embed * 2**(num_layers-1)       -> patch_size**2
    # num_patches = 128 keeps the lane axis vreg-aligned (as in production).
    B, PS = 4, 4
    H = W = PS
    P2 = PS * PS                       # 16
    NUM_PATCHES = 128                  # channel dim of x (lane axis)
    NUM_LAYERS = 2
    EMBED = 8
    IN_CHANS = 4
    MASK_RATIO = 0.5
    L_ENC = NUM_PATCHES // 2 ** (NUM_LAYERS - 1)   # 64
    D_ENC = EMBED * 2 ** (NUM_LAYERS - 1)          # 16

    key = jax.random.PRNGKey(0)
    kx, kwe, kbe, km, k1, k2 = jax.random.split(key, 6)

    x = jax.random.normal(kx, (B, H, W, NUM_PATCHES), jnp.float32)

    def lin_init(k, out_f, in_f):
        bound = 1.0 / np.sqrt(in_f)
        kw, kb = jax.random.split(k)
        w = jax.random.uniform(kw, (out_f, in_f), jnp.float32, -bound, bound)
        b = jax.random.uniform(kb, (out_f,), jnp.float32, -bound, bound)
        return w, b

    Wrb, brb = lin_init(k1, NUM_PATCHES, L_ENC)   # linear_rollback
    Wdec, bdec = lin_init(k2, P2, D_ENC)          # linear_decoder

    # TODO(synk): the injected Swin transformer encoder (window attention,
    # patch merging, MAE token masking) is an external module; it is replaced
    # here by a deterministic synthetic stand-in producing z:(B,1,L,D) and a
    # binary mask:(B,num_patches).  Only SwinMSP's own head + loss is kernelized.
    We = jax.random.normal(kwe, (H * W * NUM_PATCHES, L_ENC * D_ENC),
                           jnp.float32) * 0.05
    be = jax.random.normal(kbe, (L_ENC * D_ENC,), jnp.float32) * 0.05
    z_enc = jnp.tanh(x.reshape(B, -1) @ We + be).reshape(B, 1, L_ENC, D_ENC)
    mask = (jax.random.uniform(km, (B, NUM_PATCHES)) < MASK_RATIO).astype(jnp.float32)

    loss = swin_msp_forward(x, z_enc, mask, Wrb, brb, Wdec, bdec, IN_CHANS,
                            block_batch=2)
    loss = jax.block_until_ready(loss)

    ref = reference_forward(x, z_enc, mask, Wrb, brb, Wdec, bdec, IN_CHANS)
    assert np.isfinite(float(loss))
    # bf16 decoder matmuls vs f32 reference -> allow ~2e-2 relative slack
    assert np.allclose(float(loss), float(ref), rtol=2e-2, atol=2e-3), (
        float(loss), float(ref))
    print("KERNEL_OK")
</pallas_src>

<mosaic_0001>
module attributes {stable_mosaic.version = 11 : i64} {
  func.func @swinmsp_loss_kernel(%arg0: i32, %arg1: memref<2x16x128xf32, #tpu.memory_space<vmem>>, %arg2: memref<2x16x64xbf16, #tpu.memory_space<vmem>>, %arg3: memref<2x1x128xf32, #tpu.memory_space<vmem>>, %arg4: memref<64x128xbf16, #tpu.memory_space<vmem>>, %arg5: memref<16x16xbf16, #tpu.memory_space<vmem>>, %arg6: memref<16x128xf32, #tpu.memory_space<vmem>>, %arg7: memref<32x32xf32, #tpu.memory_space<vmem>>, %arg8: memref<2x16x128xf32, #tpu.memory_space<vmem>>, %arg9: memref<1x1x128xf32, #tpu.memory_space<vmem>>) attributes {dimension_semantics = [#tpu.dimension_semantics<parallel>], iteration_bounds = array<i64: 2>, scalar_prefetch = 0 : i64, scratch_operands = 0 : i64, tpu.core_type = #tpu.core_type<tc>, window_params = [{transform_indices = @transform_0, window_bounds = array<i64: 2, 16, 128>}, {transform_indices = @transform_1, window_bounds = array<i64: 2, 16, 64>}, {transform_indices = @transform_2, window_bounds = array<i64: 2, 1, 128>}, {pipeline_mode = #tpu.pipeline_mode<synchronous>, transform_indices = @transform_3, window_bounds = array<i64: 64, 128>}, {pipeline_mode = #tpu.pipeline_mode<synchronous>, transform_indices = @transform_4, window_bounds = array<i64: 16, 16>}, {pipeline_mode = #tpu.pipeline_mode<synchronous>, transform_indices = @transform_5, window_bounds = array<i64: 16, 128>}, {pipeline_mode = #tpu.pipeline_mode<synchronous>, transform_indices = @transform_6, window_bounds = array<i64: 32, 32>}, {pipeline_mode = #tpu.pipeline_mode<synchronous>, transform_indices = @transform_7, window_bounds = array<i64: 2, 16, 128>}, {transform_indices = @transform_8, window_bounds = array<i64: 1, 1, 128>}]} {
    %c0 = arith.constant 0 : index
    %c0_0 = arith.constant 0 : index
    %0 = vector.load %arg4[%c0, %c0_0] : memref<64x128xbf16, #tpu.memory_space<vmem>>, vector<64x128xbf16>
    %c0_1 = arith.constant 0 : index
    %c0_2 = arith.constant 0 : index
    %1 = vector.load %arg5[%c0_1, %c0_2] : memref<16x16xbf16, #tpu.memory_space<vmem>>, vector<16x16xbf16>
    %c0_3 = arith.constant 0 : index
    %c0_4 = arith.constant 0 : index
    %2 = vector.load %arg6[%c0_3, %c0_4] : memref<16x128xf32, #tpu.memory_space<vmem>>, vector<16x128xf32>
    %c0_5 = arith.constant 0 : index
    %c0_6 = arith.constant 0 : index
    %3 = vector.load %arg7[%c0_5, %c0_6] : memref<32x32xf32, #tpu.memory_space<vmem>>, vector<32x32xf32>
    %c0_7 = arith.constant 0 : index
    %c0_8 = arith.constant 0 : index
    %c0_9 = arith.constant 0 : index
    %4 = vector.load %arg8[%c0_7, %c0_8, %c0_9] : memref<2x16x128xf32, #tpu.memory_space<vmem>>, vector<1x16x128xf32>
    %5 = vector.shape_cast %4 : vector<1x16x128xf32> to vector<16x128xf32>
    %c1 = arith.constant 1 : index
    %c0_10 = arith.constant 0 : index
    %c0_11 = arith.constant 0 : index
    %6 = vector.load %arg8[%c1, %c0_10, %c0_11] : memref<2x16x128xf32, #tpu.memory_space<vmem>>, vector<1x16x128xf32>
    %7 = vector.shape_cast %6 : vector<1x16x128xf32> to vector<16x128xf32>
    %8 = tpu.iota {dimensions = array<i32: 1>} : vector<32x128xi32>
    %c-2_i32 = arith.constant -2 : i32
    %9 = vector.broadcast %c-2_i32 : i32 to vector<32x128xi32>
    %10 = arith.addi %8, %9 : vector<32x128xi32>
    %c0_i32 = arith.constant 0 : i32
    %11 = vector.broadcast %c0_i32 : i32 to vector<32x128xi32>
    %12 = arith.cmpi sge, %10, %11 : vector<32x128xi32>
    %c-2_i32_12 = arith.constant -2 : i32
    %13 = vector.broadcast %c-2_i32_12 : i32 to vector<32x128xi32>
    %14 = arith.addi %8, %13 : vector<32x128xi32>
    %c128_i32 = arith.constant 128 : i32
    %15 = vector.broadcast %c128_i32 : i32 to vector<32x128xi32>
    %16 = arith.cmpi slt, %14, %15 : vector<32x128xi32>
    %17 = arith.andi %12, %16 : vector<32x128xi1>
    %c-1_i32 = arith.constant -1 : i32
    %18 = vector.broadcast %c-1_i32 : i32 to vector<32x128xi32>
    %19 = arith.addi %8, %18 : vector<32x128xi32>
    %c0_i32_13 = arith.constant 0 : i32
    %20 = vector.broadcast %c0_i32_13 : i32 to vector<32x128xi32>
    %21 = arith.cmpi sge, %19, %20 : vector<32x128xi32>
    %c-1_i32_14 = arith.constant -1 : i32
    %22 = vector.broadcast %c-1_i32_14 : i32 to vector<32x128xi32>
    %23 = arith.addi %8, %22 : vector<32x128xi32>
    %c128_i32_15 = arith.constant 128 : i32
    %24 = vector.broadcast %c128_i32_15 : i32 to vector<32x128xi32>
    %25 = arith.cmpi slt, %23, %24 : vector<32x128xi32>
    %26 = arith.andi %21, %25 : vector<32x128xi1>
    %c1_i32 = arith.constant 1 : i32
    %27 = vector.broadcast %c1_i32 : i32 to vector<32x128xi32>
    %28 = arith.addi %8, %27 : vector<32x128xi32>
    %c0_i32_16 = arith.constant 0 : i32
    %29 = vector.broadcast %c0_i32_16 : i32 to vector<32x128xi32>
    %30 = arith.cmpi sge, %28, %29 : vector<32x128xi32>
    %c1_i32_17 = arith.constant 1 : i32
    %31 = vector.broadcast %c1_i32_17 : i32 to vector<32x128xi32>
    %32 = arith.addi %8, %31 : vector<32x128xi32>
    %c128_i32_18 = arith.constant 128 : i32
    %33 = vector.broadcast %c128_i32_18 : i32 to vector<32x128xi32>
    %34 = arith.cmpi slt, %32, %33 : vector<32x128xi32>
    %35 = arith.andi %30, %34 : vector<32x128xi1>
    %c2_i32 = arith.constant 2 : i32
    %36 = vector.broadcast %c2_i32 : i32 to vector<32x128xi32>
    %37 = arith.addi %8, %36 : vector<32x128xi32>
    %c0_i32_19 = arith.constant 0 : i32
    %38 = vector.broadcast %c0_i32_19 : i32 to vector<32x128xi32>
    %39 = arith.cmpi sge, %37, %38 : vector<32x128xi32>
    %c2_i32_20 = arith.constant 2 : i32
    %40 = vector.broadcast %c2_i32_20 : i32 to vector<32x128xi32>
    %41 = arith.addi %8, %40 : vector<32x128xi32>
    %c128_i32_21 = arith.constant 128 : i32
    %42 = vector.broadcast %c128_i32_21 : i32 to vector<32x128xi32>
    %43 = arith.cmpi slt, %41, %42 : vector<32x128xi32>
    %44 = arith.andi %39, %43 : vector<32x128xi1>
    %cst = arith.constant 0.000000e+00 : f32
    %45 = vector.broadcast %cst : f32 to vector<1x128xf32>
    %c0_22 = arith.constant 0 : index
    %c0_23 = arith.constant 0 : index
    %c0_24 = arith.constant 0 : index
    %46 = vector.load %arg1[%c0_22, %c0_23, %c0_24] : memref<2x16x128xf32, #tpu.memory_space<vmem>>, vector<1x16x128xf32>
    %47 = vector.shape_cast %46 : vector<1x16x128xf32> to vector<16x128xf32>
    %c0_25 = arith.constant 0 : index
    %c0_26 = arith.constant 0 : index
    %c0_27 = arith.constant 0 : index
    %48 = vector.load %arg2[%c0_25, %c0_26, %c0_27] : memref<2x16x64xbf16, #tpu.memory_space<vmem>>, vector<1x16x64xbf16>
    %49 = vector.shape_cast %48 : vector<1x16x64xbf16> to vector<16x64xbf16>
    %cst_28 = arith.constant dense<0.000000e+00> : vector<16x128xf32>
    %50 = tpu.matmul %49, %0, %cst_28 {dimension_numbers = #tpu.dot_dimension_numbers<[1], [0], [0], [1], [0, 0, 1, 1], [], []>} : vector<16x64xbf16>, vector<64x128xbf16>, vector<16x128xf32> -> vector<16x128xf32>
    %51 = arith.truncf %50 : vector<16x128xf32> to vector<16x128xbf16>
    %cst_29 = arith.constant dense<0.000000e+00> : vector<16x128xf32>
    %52 = tpu.matmul %1, %51, %cst_29 {dimension_numbers = #tpu.dot_dimension_numbers<[1], [0], [0], [1], [0, 0, 1, 1], [], []>} : vector<16x16xbf16>, vector<16x128xbf16>, vector<16x128xf32> -> vector<16x128xf32>
    %53 = arith.addf %52, %2 : vector<16x128xf32>
    %54 = arith.mulf %47, %47 : vector<16x128xf32>
    %55 = tpu.concatenate %47, %54 in 0 : vector<16x128xf32>, vector<16x128xf32> -> vector<32x128xf32>
    %c2_i32_30 = arith.constant 2 : i32
    %56 = tpu.dynamic_rotate %55 by %c2_i32_30 dim 1 : vector<32x128xf32>, i32 -> vector<32x128xf32>
    %cst_31 = arith.constant 0.000000e+00 : f32
    %57 = vector.broadcast %cst_31 : f32 to vector<32x128xf32>
    %58 = arith.select %17, %56, %57 : vector<32x128xi1>, vector<32x128xf32>
    %59 = arith.addf %55, %58 : vector<32x128xf32>
    %c1_i32_32 = arith.constant 1 : i32
    %60 = tpu.dynamic_rotate %55 by %c1_i32_32 dim 1 : vector<32x128xf32>, i32 -> vector<32x128xf32>
    %cst_33 = arith.constant 0.000000e+00 : f32
    %61 = vector.broadcast %cst_33 : f32 to vector<32x128xf32>
    %62 = arith.select %26, %60, %61 : vector<32x128xi1>, vector<32x128xf32>
    %63 = arith.addf %59, %62 : vector<32x128xf32>
    %c127_i32 = arith.constant 127 : i32
    %64 = tpu.dynamic_rotate %55 by %c127_i32 dim 1 : vector<32x128xf32>, i32 -> vector<32x128xf32>
    %cst_34 = arith.constant 0.000000e+00 : f32
    %65 = vector.broadcast %cst_34 : f32 to vector<32x128xf32>
    %66 = arith.select %35, %64, %65 : vector<32x128xi1>, vector<32x128xf32>
    %67 = arith.addf %63, %66 : vector<32x128xf32>
    %c126_i32 = arith.constant 126 : i32
    %68 = tpu.dynamic_rotate %55 by %c126_i32 dim 1 : vector<32x128xf32>, i32 -> vector<32x128xf32>
    %cst_35 = arith.constant 0.000000e+00 : f32
    %69 = vector.broadcast %cst_35 : f32 to vector<32x128xf32>
    %70 = arith.select %44, %68, %69 : vector<32x128xi1>, vector<32x128xf32>
    %71 = arith.addf %67, %70 : vector<32x128xf32>
    %cst_36 = arith.constant dense<0.000000e+00> : vector<32x128xf32>
    %72 = tpu.matmul %3, %71, %cst_36 {dimension_numbers = #tpu.dot_dimension_numbers<[1], [0], [0], [1], [0, 0, 1, 1], [], []>} : vector<32x32xf32>, vector<32x128xf32>, vector<32x128xf32> -> vector<32x128xf32>
    %73 = vector.extract_strided_slice %72 {offsets = [0, 0], sizes = [16, 128], strides = [1, 1]} : vector<32x128xf32> to vector<16x128xf32>
    %74 = vector.extract_strided_slice %72 {offsets = [16, 0], sizes = [16, 128], strides = [1, 1]} : vector<32x128xf32> to vector<16x128xf32>
    %75 = arith.mulf %73, %5 : vector<16x128xf32>
    %76 = arith.mulf %73, %75 : vector<16x128xf32>
    %77 = arith.subf %74, %76 : vector<16x128xf32>
    %78 = arith.mulf %77, %7 : vector<16x128xf32>
    %cst_37 = arith.constant 0.000000e+00 : f32
    %79 = vector.broadcast %cst_37 : f32 to vector<16x128xf32>
    %80 = arith.maximumf %78, %79 : vector<16x128xf32>
    %81 = arith.subf %47, %75 : vector<16x128xf32>
    %cst_38 = arith.constant 9.99999997E-7 : f32
    %82 = vector.broadcast %cst_38 : f32 to vector<16x128xf32>
    %83 = arith.addf %80, %82 : vector<16x128xf32>
    %84 = math.rsqrt %83 : vector<16x128xf32>
    %85 = arith.mulf %81, %84 : vector<16x128xf32>
    %86 = arith.subf %85, %53 : vector<16x128xf32>
    %87 = arith.mulf %86, %86 : vector<16x128xf32>
    %cst_39 = arith.constant dense<0.000000e+00> : vector<128xf32>
    %88 = vector.multi_reduction <add>, %87, %cst_39 [0] : vector<16x128xf32> to vector<128xf32>
    %89 = vector.shape_cast %88 : vector<128xf32> to vector<1x128xf32>
    %cst_40 = arith.constant 6.250000e-02 : f32
    %90 = vector.broadcast %cst_40 : f32 to vector<1x128xf32>
    %91 = arith.mulf %89, %90 : vector<1x128xf32>
    %c0_41 = arith.constant 0 : index
    %c0_42 = arith.constant 0 : index
    %c0_43 = arith.constant 0 : index
    %92 = vector.load %arg3[%c0_41, %c0_42, %c0_43] : memref<2x1x128xf32, #tpu.memory_space<vmem>>, vector<1x1x128xf32>
    %93 = vector.shape_cast %92 : vector<1x1x128xf32> to vector<1x128xf32>
    %94 = arith.mulf %91, %93 : vector<1x128xf32>
    %95 = arith.addf %45, %94 : vector<1x128xf32>
    %c1_44 = arith.constant 1 : index
    %c0_45 = arith.constant 0 : index
    %c0_46 = arith.constant 0 : index
    %96 = vector.load %arg1[%c1_44, %c0_45, %c0_46] : memref<2x16x128xf32, #tpu.memory_space<vmem>>, vector<1x16x128xf32>
    %97 = vector.shape_cast %96 : vector<1x16x128xf32> to vector<16x128xf32>
    %c1_47 = arith.constant 1 : index
    %c0_48 = arith.constant 0 : index
    %c0_49 = arith.constant 0 : index
    %98 = vector.load %arg2[%c1_47, %c0_48, %c0_49] : memref<2x16x64xbf16, #tpu.memory_space<vmem>>, vector<1x16x64xbf16>
    %99 = vector.shape_cast %98 : vector<1x16x64xbf16> to vector<16x64xbf16>
    %cst_50 = arith.constant dense<0.000000e+00> : vector<16x128xf32>
    %100 = tpu.matmul %99, %0, %cst_50 {dimension_numbers = #tpu.dot_dimension_numbers<[1], [0], [0], [1], [0, 0, 1, 1], [], []>} : vector<16x64xbf16>, vector<64x128xbf16>, vector<16x128xf32> -> vector<16x128xf32>
    %101 = arith.truncf %100 : vector<16x128xf32> to vector<16x128xbf16>
    %cst_51 = arith.constant dense<0.000000e+00> : vector<16x128xf32>
    %102 = tpu.matmul %1, %101, %cst_51 {dimension_numbers = #tpu.dot_dimension_numbers<[1], [0], [0], [1], [0, 0, 1, 1], [], []>} : vector<16x16xbf16>, vector<16x128xbf16>, vector<16x128xf32> -> vector<16x128xf32>
    %103 = arith.addf %102, %2 : vector<16x128xf32>
    %104 = arith.mulf %97, %97 : vector<16x128xf32>
    %105 = tpu.concatenate %97, %104 in 0 : vector<16x128xf32>, vector<16x128xf32> -> vector<32x128xf32>
    %c2_i32_52 = arith.constant 2 : i32
    %106 = tpu.dynamic_rotate %105 by %c2_i32_52 dim 1 : vector<32x128xf32>, i32 -> vector<32x128xf32>
    %cst_53 = arith.constant 0.000000e+00 : f32
    %107 = vector.broadcast %cst_53 : f32 to vector<32x128xf32>
    %108 = arith.select %17, %106, %107 : vector<32x128xi1>, vector<32x128xf32>
    %109 = arith.addf %105, %108 : vector<32x128xf32>
    %c1_i32_54 = arith.constant 1 : i32
    %110 = tpu.dynamic_rotate %105 by %c1_i32_54 dim 1 : vector<32x128xf32>, i32 -> vector<32x128xf32>
    %cst_55 = arith.constant 0.000000e+00 : f32
    %111 = vector.broadcast %cst_55 : f32 to vector<32x128xf32>
    %112 = arith.select %26, %110, %111 : vector<32x128xi1>, vector<32x128xf32>
    %113 = arith.addf %109, %112 : vector<32x128xf32>
    %c127_i32_56 = arith.constant 127 : i32
    %114 = tpu.dynamic_rotate %105 by %c127_i32_56 dim 1 : vector<32x128xf32>, i32 -> vector<32x128xf32>
    %cst_57 = arith.constant 0.000000e+00 : f32
    %115 = vector.broadcast %cst_57 : f32 to vector<32x128xf32>
    %116 = arith.select %35, %114, %115 : vector<32x128xi1>, vector<32x128xf32>
    %117 = arith.addf %113, %116 : vector<32x128xf32>
    %c126_i32_58 = arith.constant 126 : i32
    %118 = tpu.dynamic_rotate %105 by %c126_i32_58 dim 1 : vector<32x128xf32>, i32 -> vector<32x128xf32>
    %cst_59 = arith.constant 0.000000e+00 : f32
    %119 = vector.broadcast %cst_59 : f32 to vector<32x128xf32>
    %120 = arith.select %44, %118, %119 : vector<32x128xi1>, vector<32x128xf32>
    %121 = arith.addf %117, %120 : vector<32x128xf32>
    %cst_60 = arith.constant dense<0.000000e+00> : vector<32x128xf32>
    %122 = tpu.matmul %3, %121, %cst_60 {dimension_numbers = #tpu.dot_dimension_numbers<[1], [0], [0], [1], [0, 0, 1, 1], [], []>} : vector<32x32xf32>, vector<32x128xf32>, vector<32x128xf32> -> vector<32x128xf32>
    %123 = vector.extract_strided_slice %122 {offsets = [0, 0], sizes = [16, 128], strides = [1, 1]} : vector<32x128xf32> to vector<16x128xf32>
    %124 = vector.extract_strided_slice %122 {offsets = [16, 0], sizes = [16, 128], strides = [1, 1]} : vector<32x128xf32> to vector<16x128xf32>
    %125 = arith.mulf %123, %5 : vector<16x128xf32>
    %126 = arith.mulf %123, %125 : vector<16x128xf32>
    %127 = arith.subf %124, %126 : vector<16x128xf32>
    %128 = arith.mulf %127, %7 : vector<16x128xf32>
    %cst_61 = arith.constant 0.000000e+00 : f32
    %129 = vector.broadcast %cst_61 : f32 to vector<16x128xf32>
    %130 = arith.maximumf %128, %129 : vector<16x128xf32>
    %131 = arith.subf %97, %125 : vector<16x128xf32>
    %cst_62 = arith.constant 9.99999997E-7 : f32
    %132 = vector.broadcast %cst_62 : f32 to vector<16x128xf32>
    %133 = arith.addf %130, %132 : vector<16x128xf32>
    %134 = math.rsqrt %133 : vector<16x128xf32>
    %135 = arith.mulf %131, %134 : vector<16x128xf32>
    %136 = arith.subf %135, %103 : vector<16x128xf32>
    %137 = arith.mulf %136, %136 : vector<16x128xf32>
    %cst_63 = arith.constant dense<0.000000e+00> : vector<128xf32>
    %138 = vector.multi_reduction <add>, %137, %cst_63 [0] : vector<16x128xf32> to vector<128xf32>
    %139 = vector.shape_cast %138 : vector<128xf32> to vector<1x128xf32>
    %cst_64 = arith.constant 6.250000e-02 : f32
    %140 = vector.broadcast %cst_64 : f32 to vector<1x128xf32>
    %141 = arith.mulf %139, %140 : vector<1x128xf32>
    %c1_65 = arith.constant 1 : index
    %c0_66 = arith.constant 0 : index
    %c0_67 = arith.constant 0 : index
    %142 = vector.load %arg3[%c1_65, %c0_66, %c0_67] : memref<2x1x128xf32, #tpu.memory_space<vmem>>, vector<1x1x128xf32>
    %143 = vector.shape_cast %142 : vector<1x1x128xf32> to vector<1x128xf32>
    %144 = arith.mulf %141, %143 : vector<1x128xf32>
    %145 = arith.addf %95, %144 : vector<1x128xf32>
    %c0_68 = arith.constant 0 : index
    %c0_69 = arith.constant 0 : index
    %c0_70 = arith.constant 0 : index
    %146 = vector.load %arg9[%c0_68, %c0_69, %c0_70] : memref<1x1x128xf32, #tpu.memory_space<vmem>>, vector<1x1x128xf32>
    %147 = vector.shape_cast %146 : vector<1x1x128xf32> to vector<1x128xf32>
    %148 = vector.shape_cast %145 : vector<1x128xf32> to vector<1x1x128xf32>
    tpu.vector_store %arg9[%c0_68, %c0_69, %c0_70], %148 {strides = array<i32>} : memref<1x1x128xf32, #tpu.memory_space<vmem>>, vector<1x1x128xf32>,
    return
  }
  func.func @transform_0(%arg0: i32) -> (i32, i32, i32) {
    %c0_i32 = arith.constant 0 : i32
    %c0_i32_0 = arith.constant 0 : i32
    %c0_i32_1 = arith.constant 0 : i32
    return %arg0, %c0_i32, %c0_i32_0 : i32, i32, i32
  }
  func.func @transform_1(%arg0: i32) -> (i32, i32, i32) {
    %c0_i32 = arith.constant 0 : i32
    %c0_i32_0 = arith.constant 0 : i32
    %c0_i32_1 = arith.constant 0 : i32
    return %arg0, %c0_i32, %c0_i32_0 : i32, i32, i32
  }
  func.func @transform_2(%arg0: i32) -> (i32, i32, i32) {
    %c0_i32 = arith.constant 0 : i32
    %c0_i32_0 = arith.constant 0 : i32
    %c0_i32_1 = arith.constant 0 : i32
    return %arg0, %c0_i32, %c0_i32_0 : i32, i32, i32
  }
  func.func @transform_3(%arg0: i32) -> (i32, i32) {
    %c0_i32 = arith.constant 0 : i32
    %c0_i32_0 = arith.constant 0 : i32
    %c0_i32_1 = arith.constant 0 : i32
    return %c0_i32, %c0_i32_0 : i32, i32
  }
  func.func @transform_4(%arg0: i32) -> (i32, i32) {
    %c0_i32 = arith.constant 0 : i32
    %c0_i32_0 = arith.constant 0 : i32
    %c0_i32_1 = arith.constant 0 : i32
    return %c0_i32, %c0_i32_0 : i32, i32
  }
  func.func @transform_5(%arg0: i32) -> (i32, i32) {
    %c0_i32 = arith.constant 0 : i32
    %c0_i32_0 = arith.constant 0 : i32
    %c0_i32_1 = arith.constant 0 : i32
    return %c0_i32, %c0_i32_0 : i32, i32
  }
  func.func @transform_6(%arg0: i32) -> (i32, i32) {
    %c0_i32 = arith.constant 0 : i32
    %c0_i32_0 = arith.constant 0 : i32
    %c0_i32_1 = arith.constant 0 : i32
    return %c0_i32, %c0_i32_0 : i32, i32
  }
  func.func @transform_7(%arg0: i32) -> (i32, i32, i32) {
    %c0_i32 = arith.constant 0 : i32
    %c0_i32_0 = arith.constant 0 : i32
    %c0_i32_1 = arith.constant 0 : i32
    %c0_i32_2 = arith.constant 0 : i32
    return %c0_i32, %c0_i32_0, %c0_i32_1 : i32, i32, i32
  }
  func.func @transform_8(%arg0: i32) -> (i32, i32, i32) {
    %c0_i32 = arith.constant 0 : i32
    %c0_i32_0 = arith.constant 0 : i32
    %c0_i32_1 = arith.constant 0 : i32
    return %arg0, %c0_i32, %c0_i32_0 : i32, i32, i32
  }
}

</mosaic_0001>

<bundles_post_ra>
// kernel: tpu_custom_call.1
= control target key start
LH: loop header
LB: loop body
LE: loop exit
PB: predicated region body
PF: predicated region fallthrough
CT: control target
= control target key end

     0   :  { %s2560_s0 = inlined_call_operand.hbm [shape: f32[4,16,128], index: 0, kind: input, shape index: {}]   ;;  %s2561_s1 = inlined_call_operand.hbm [shape: bf16[4,16,64], index: 1, kind: input, shape index: {}]   ;;  %s2562_s2 = inlined_call_operand.hbm [shape: f32[4,1,128], index: 2, kind: input, shape index: {}]   ;;  %s2563_s3 = inlined_call_operand.hbm [shape: bf16[64,128], index: 3, kind: input, shape index: {}]   ;;  %s2564_s4 = inlined_call_operand.hbm [shape: bf16[16,16], index: 4, kind: input, shape index: {}]   ;;  %s2565_s5 = inlined_call_operand.vmem [shape: f32[16,128], index: 5, kind: input, shape index: {}]   ;;  %s2566_s6 = inlined_call_operand.hbm [shape: f32[32,32], index: 6, kind: input, shape index: {}]   ;;  %s2567_s7 = inlined_call_operand.hbm [shape: f32[2,16,128], index: 7, kind: input, shape index: {}]   ;;  %s2568_s8 = inlined_call_operand.hbm [shape: f32[2,1,128], index: 8, kind: output, shape index: {}]  }
   0x1   :  { %2595 = sst [smem:[#allocation25_spill]] %s2561_s1 }
   0x2   :  { %2596 = sst [smem:[#allocation26_spill]] %s2563_s3 }
   0x3   :  { %2597 = sst [smem:[#allocation27_spill]] %s2566_s6 }
   0x4   :  { %2598 = sst [smem:[#allocation28_spill]] %s2568_s8 }
   0x5   :  { %13 = vsyncpa [#allocation3], 0 }
   0x6   :  { %15 = vsyncpa [#allocation3 + $0x1], 0 }
   0x7   :  { %16 = vsyncpa [#allocation6], 0 }
   0x8   :  { %18 = vsyncpa [#allocation6 + $0x1], 0 }
   0x9   :  { %19 = vsyncpa [#allocation9], 0 }
   0xa   :  { %20 = vsyncpa [#allocation12], 0 }
   0xb   :  { %21 = vsyncpa [#allocation4], 0 }
   0xc   :  { %23 = vsyncpa [#allocation4 + $0x1], 0  ;;  %s1911_s27 = smov 0   ;;  %s1913_s28 = smov 0  }
   0xd   :  { %s1915_s29 = smov 0   ;;  %s1917_s30 = smov 0  }
   0xe LB: > { %2599 = sst [smem:[#allocation20_spill]] %s1832_s27  ;;  %s1932_s9 = sadd.s32 4294967295, %s1844_s30   ;;  %s1844_s30 = sphi %s1917_s30, %s2636_s30   ;;  %s1840_s29 = sphi %s1915_s29, %s2638_s29   ;;  %s1836_s28 = sphi %s1913_s28, %s2640_s28   ;;  %s1832_s27 = sphi %s1911_s27, %s2639_s27  }
   0xf   : > { %2600 = sst [smem:[#allocation21_spill]] %s1840_s29  ;;  %s1272_s10 = sadd.s32 4294967294, %s1844_s30  }
  0x10   : > { %p49_p0 = scmp.ne.s32.totalorder %s1836_s28, %s1832_s27  ;;  %p2569_p1 = scmp.eq.s32.totalorder %s1932_s9, 0 }
  0x11   : > { %p236_p3 = scmp.eq.s32.totalorder %s1272_s10, 1  ;;  %p1273_p5 = scmp.ge.s32.totalorder %s1844_s30, 1 }
  0x12   : > { %p1941_p4 = por %p2569_p1, %p49_p0  ;;  %p243_p7 = scmp.lt.s32.totalorder %s1844_s30, 3 }
  0x13   : > { %p1946_p6 = por %p236_p3, %p49_p0  ;;  %s1846_s14 = smov [#allocation8]  }
  0x14   : > { %s2601_s11 = scalar_select %p1941_p4, 1, 0 }
  0x15   : > { %s2602_s12 = scalar_select %p1946_p6, 1, 0 }
  0x16   : > { %p1951_p8 = pnand %p1273_p5, %p243_p7  ;;  %s255_s15 = sshll.u32 %s1846_s14, 4  ;;  %s1955_s15 = int_to_ptr.vmem [resolvable:$true] %s255_s15 }
  0x17   : > { %2603 = sst [smem:[#allocation22_spill]] %s2602_s12  ;;  %s1847_s17 = smov [#allocation11]  }
  0x18   : > { %s2604_s13 = scalar_select %p1951_p8, 1, 0 }
  0x19   : > { %p1464_p9 = pneg %p1951_p8  ;;  %s284_s18 = sshll.u32 %s1847_s17, 4  ;;  %s1966_s18 = int_to_ptr.vmem [resolvable:$true] %s284_s18 }
  0x1a   : > { %s2606_s3 = sld [smem:[#allocation26_spill]] }
  0x1b   : > { %p1962_p11 = pnand %p1464_p9, %p2569_p1 }
  0x1d   : > { %s2605_s16 = scalar_select %p1962_p11, 1, 0 }
  0x1e   : > { %p1976_p13 = pneg %p1962_p11 }
  0x20   : > { %s1564_s21 = scalar_lea.hbm %s2606_s3, 512 }
  0x21   : > { %p1565_p12 = scmp.ne.s32.totalorder %s2606_s3, %s1564_s21  ;;  %p1571_p5 = scmp.lt.u32.totalorder %s1564_s21, %s2606_s3 }
  0x22   : > { %s2607_s24 = scalar_select %p1976_p13, 1, 0 }
  0x23   : > { %p1567_p0 = pnand %p1976_p13, %p1565_p12 }
  0x25   : > { %p1568_p3 = pneg %p1567_p0 }
  0x27   : > { %p1573_p7 = pnand %p1571_p5, %p1568_p3 }
  0x29   : > { %1576 = shalt.err (!%p1573_p7)
}
  0x2a   : > { %s1577_s10 = scalar_lea.vmem %s1955_s15, 512  ;;  %p1585_p2 = scmp.lt.s32.totalorder %s1955_s15, %s1955_s15 }
  0x2b   : > { %p1578_p9 = scmp.ne.s32.totalorder %s1955_s15, %s1577_s10  ;;  %p1586_p6 = scmp.lt.s32.totalorder %s1577_s10, %s1577_s10 }
  0x2d   : > { %p1580_p10 = pnand %p1578_p9, %p1976_p13  ;;  %p1587_p12 = por %p1586_p6, %p1585_p2 }
  0x2f   : > { %p1581_p1 = pneg %p1580_p10 }
  0x31   : > { %p1588_p0 = pnand %p1587_p12, %p1581_p1 }
  0x33   : > { %1591 = shalt.err (!%p1588_p0)
}
  0x34   : > { %s2575_s14 = smov 64   ;;  %s2577_s17 = smov 4  }
  0x35   : > { %1467 = dma.hbm_to_vmem [thread:$0]  (!%p1962_p11), %s2606_s3, 512, %s1955_s15, [#allocation9], %s2575_s14, %s2575_s14, %s2577_s17  }
  0x36   : > { %s2608_s6 = sld [smem:[#allocation27_spill]] }
  0x3c   : > { %s1592_s23 = scalar_lea.hbm %s2608_s6, 512 }
  0x3d   : > { %p1593_p1 = scmp.ne.s32.totalorder %s2608_s6, %s1592_s23  ;;  %p1599_p10 = scmp.lt.u32.totalorder %s1592_s23, %s2608_s6 }
  0x3f   : > { %p1595_p2 = pnand %p1593_p1, %p1976_p13 }
  0x41   : > { %p1596_p6 = pneg %p1595_p2 }
  0x43   : > { %p1601_p3 = pnand %p1599_p10, %p1596_p6 }
  0x45   : > { %1604 = shalt.err (!%p1601_p3)
}
  0x46   : > { %s1605_s15 = scalar_lea.vmem %s1966_s18, 512  ;;  %p1613_p12 = scmp.lt.s32.totalorder %s1966_s18, %s1966_s18 }
  0x47   : > { %p1606_p5 = scmp.ne.s32.totalorder %s1966_s18, %s1605_s15  ;;  %p1614_p0 = scmp.lt.s32.totalorder %s1605_s15, %s1605_s15 }
  0x49   : > { %p1608_p7 = pnand %p1606_p5, %p1976_p13  ;;  %p1615_p1 = por %p1614_p0, %p1613_p12 }
  0x4b   : > { %p1609_p9 = pneg %p1608_p7 }
  0x4d   : > { %p1616_p2 = pnand %p1615_p1, %p1609_p9 }
  0x4f   : > { %1619 = shalt.err (!%p1616_p2)
}
  0x50   : > { %s2571_s19 = smov 128   ;;  %s2573_s12 = smov 8  }
  0x51   : > { %1473 = dma.hbm_to_vmem [thread:$0]  (!%p1962_p11), %s2608_s6, 512, %s1966_s18, [#allocation12], %s2571_s19, %s2571_s19, %s2573_s12  }
  0x52   : > { %s2027_s22 = sadd.s32 1, %s1844_s30   ;;  %s36_s25 = sadd.s32 1, %s1840_s29 }
  0x53   : > { %2609 = sst [smem:[#allocation23_spill]] %s2027_s22  ;;  %s33_s23 = ssub.s32 %s1844_s30, %s2027_s22 }
  0x54   : > { %p34_p6 = scmp.eq.s32.totalorder %s33_s23, 0  ;;  %p43_p10 = scmp.ne.s32.totalorder %s1840_s29, %s1836_s28 }
  0x55   : > { %p44_p3 = scmp.eq.s32.totalorder %s1844_s30, 0  ;;  %p2611_p7 = scmp.eq.s32.totalorder %s1932_s9, 1 }
  0x56   : > { %s2036_s26 = scalar_select %p34_p6, %s1840_s29, %s36_s25  }
  0x57   : > { %p45_p5 = por %p44_p3, %p43_p10  ;;  %p2040_p9 = por %p2611_p7, %p43_p10 }
  0x58   : > { %2610 = sst [smem:[#allocation24_spill]] %s2036_s26  ;;  %p1495_p12 = scmp.lt.s32.totalorder %s1844_s30, 2 }
  0x59   : > { %s2612_s10 = scalar_select %p2040_p9, 1, 0 }
  0x5a   : > { %s2046_s15 = sand.u32 1, %s1840_s29   ;;  %s333_s18 = sand.u32 1, %s1844_s30  }
  0x5b   : > { %s1283_s20 = sshll.u32 %s2046_s15, 4  ;;  %p2050_p0 = pnand %p1495_p12, %p45_p5 }
  0x5c   : > { %s1328_s23 = sshll.u32 %s1844_s30, 8  ;;  %s2614_s1 = sld [smem:[#allocation25_spill]] }
  0x5d   : > { %s2613_s21 = scalar_select %p2050_p0, 1, 0 }
  0x5e   : > { %s337_s14 = scalar_lea.vmem [#allocation5], %s1283_s20  ;;  %s1852_s3 = smov [#allocation10]  }
  0x5f   : > { %s345_s17 = sshll.u32 %s337_s14, 4  ;;  %s2062_s6 = sshll.u32 %s1852_s3, 4  ;;  %s2060_s17 = int_to_ptr.vmem [resolvable:$true] %s345_s17  ;;  %s269_s6 = int_to_ptr.vmem [resolvable:$true] %s2062_s6 }
  0x60   : > { %s2064_s26 = scalar_lea.sflag [#allocation6], %s333_s18  ;;  %p2070_p2 = pneg %p2050_p0 }
  0x62   : > { %s2058_s12 = scalar_lea.hbm %s2614_s1, %s1328_s23  ;;  %s1625_s23 = scalar_lea.hbm %s2614_s1, 512 }
  0x63   : > { %s1620_s29 = scalar_lea.hbm %s2058_s12, 256  ;;  %p1626_p3 = scmp.lt.u32.totalorder %s2058_s12, %s2614_s1 }
  0x64   : > { %p1621_p1 = scmp.ne.s32.totalorder %s2058_s12, %s1620_s29  ;;  %p1627_p5 = scmp.lt.u32.totalorder %s1625_s23, %s1620_s29 }
  0x65   : > { %s2615_s19 = scalar_select %p2070_p2, 1, 0 }
  0x66   : > { %p1623_p6 = pnand %p2070_p2, %p1621_p1  ;;  %p1628_p7 = por %p1627_p5, %p1626_p3 }
  0x67   : > { %p1629_p12 = scmp.lt.u32.totalorder %s1620_s29, %s2058_s12 }
  0x68   : > { %p1624_p10 = pneg %p1623_p6 }
  0x69   : > { %p1630_p9 = por %p1629_p12, %p1628_p7 }
  0x6b   : > { %p1631_p4 = pnand %p1630_p9, %p1624_p10 }
  0x6d   : > { %1634 = shalt.err (!%p1631_p4)
}
  0x6e   : > { %s1635_s18 = scalar_lea.vmem %s2060_s17, 256  ;;  %s1853_s20 = smov [#allocation5]  }
  0x6f   : > { %p1636_p1 = scmp.ne.s32.totalorder %s2060_s17, %s1635_s18  ;;  %s1640_s14 = sshll.u32 %s1853_s20, 4  ;;  %s1641_s14 = int_to_ptr.vmem [resolvable:$false] %s1640_s14 }
  0x70   : > { %s1642_s25 = scalar_lea.vmem %s1641_s14, 512  ;;  %p1643_p11 = scmp.lt.s32.totalorder %s2060_s17, %s1641_s14 }
  0x71   : > { %p1638_p6 = pnand %p1636_p1, %p2070_p2  ;;  %p1644_p13 = scmp.lt.s32.totalorder %s1642_s25, %s1635_s18 }
  0x73   : > { %p1639_p8 = pneg %p1638_p6  ;;  %p1645_p3 = por %p1644_p13, %p1643_p11 }
  0x75   : > { %p1646_p5 = pnand %p1645_p3, %p1639_p8 }
  0x77   : > { %1649 = shalt.err (!%p1646_p5)
}
  0x78   : > { %s2616_s29 = smov 4   ;;  %s2617_s23 = smov 64  }
  0x79   : > { %1483 = dma.hbm_to_vmem [thread:$0]  (!%p2050_p0), %s2058_s12, 256, %s2060_s17, %s2064_s26, %s2617_s23, %s2617_s23, %s2616_s29  }
  0x7a   : > { %s1650_s14 = scalar_lea.hbm %s2564_s4, 128  ;;  %p2618_p8 = scmp.ne.s32.totalorder %s2607_s24, 0 }
  0x7b   : > { %p1651_p4 = scmp.ne.s32.totalorder %s2564_s4, %s1650_s14  ;;  %p1657_p9 = scmp.lt.u32.totalorder %s1650_s14, %s2564_s4 }
  0x7d   : > { %p1653_p11 = pnand %p1651_p4, %p2618_p8 }
  0x7f   : > { %p1654_p13 = pneg %p1653_p11 }
  0x81   : > { %p1659_p10 = pnand %p1657_p9, %p1654_p13 }
  0x83   : > { %1662 = shalt.err (!%p1659_p10)
}
  0x84   : > { %s1663_s27 = scalar_lea.vmem %s269_s6, 128  ;;  %p1671_p6 = scmp.lt.s32.totalorder %s269_s6, %s269_s6 }
  0x85   : > { %p1664_p7 = scmp.ne.s32.totalorder %s269_s6, %s1663_s27  ;;  %p1672_p3 = scmp.lt.s32.totalorder %s1663_s27, %s1663_s27 }
  0x87   : > { %p1666_p12 = pnand %p1664_p7, %p2618_p8  ;;  %p1673_p5 = por %p1672_p3, %p1671_p6 }
  0x89   : > { %p1667_p1 = pneg %p1666_p12 }
  0x8b   : > { %p1674_p0 = pnand %p1673_p5, %p1667_p1 }
  0x8d   : > { %1677 = shalt.err (!%p1674_p0)
}
  0x8e   : > { %p2619_p4 = scmp.ne.s32.totalorder %s2605_s16, 0  ;;  %s1854_s12 = smov [#allocation13]  }
  0x8f   : > { %s297_s22 = sshll.u32 %s1854_s12, 4  ;;  %s1279_s3 = sshll.u32 %s2046_s15, 5  ;;  %s298_s22 = int_to_ptr.vmem [resolvable:$true] %s297_s22 }
  0x90   : > { %1470 = dma.hbm_to_vmem [thread:$0]  (!%p2619_p4), %s2564_s4, 128, %s269_s6, [#allocation9], %s2617_s23, %s2617_s23, %s2616_s29  }
  0x91   : > { %s1678_s14 = scalar_lea.hbm %s2567_s7, 512 }
  0x92   : > { %p1679_p0 = scmp.ne.s32.totalorder %s2567_s7, %s1678_s14  ;;  %p1685_p9 = scmp.lt.u32.totalorder %s1678_s14, %s2567_s7 }
  0x94   : > { %p1681_p11 = pnand %p1679_p0, %p2618_p8 }
  0x96   : > { %p1682_p13 = pneg %p1681_p11 }
  0x98   : > { %p1687_p10 = pnand %p1685_p9, %p1682_p13 }
  0x9a   : > { %1690 = shalt.err (!%p1687_p10)
}
  0x9b   : > { %s1691_s6 = scalar_lea.vmem %s298_s22, 512  ;;  %p1699_p6 = scmp.lt.s32.totalorder %s298_s22, %s298_s22 }
  0x9c   : > { %p1692_p7 = scmp.ne.s32.totalorder %s298_s22, %s1691_s6  ;;  %p1700_p3 = scmp.lt.s32.totalorder %s1691_s6, %s1691_s6 }
  0x9e   : > { %p1694_p12 = pnand %p1692_p7, %p2618_p8  ;;  %p1701_p5 = por %p1700_p3, %p1699_p6 }
  0xa0   : > { %p1695_p1 = pneg %p1694_p12 }
  0xa2   : > { %p1702_p2 = pnand %p1701_p5, %p1695_p1 }
  0xa4   : > { %1705 = shalt.err (!%p1702_p2)
}
  0xa5   : > { %s2620_s29 = smov 8   ;;  %s2621_s23 = smov 128  }
  0xa6   : > { %1476 = dma.hbm_to_vmem [thread:$0]  (!%p2619_p4), %s2567_s7, 512, %s298_s22, [#allocation12], %s2621_s23, %s2621_s23, %s2620_s29  }
  0xa7   : > { %s1326_s24 = sshll.u32 %s1844_s30, 9  ;;  %s315_s16 = scalar_lea.vmem [#allocation2], %s1279_s3 }
  0xa8   : > { %s2145_s27 = scalar_lea.hbm %s2560_s0, %s1326_s24  ;;  %s323_s14 = sshll.u32 %s315_s16, 4  ;;  %s2147_s14 = int_to_ptr.vmem [resolvable:$true] %s323_s14 }
  0xa9   : > { %s1287_s18 = sshll.u32 %s2046_s15, 1  ;;  %s312_s25 = scalar_lea.sflag [#allocation3], %s2046_s15 }
  0xaa   : > { %s1706_s1 = scalar_lea.hbm %s2145_s27, 512  ;;  %p2622_p8 = scmp.ne.s32.totalorder %s2615_s19, 0 }
  0xab   : > { %p1707_p2 = scmp.ne.s32.totalorder %s2145_s27, %s1706_s1  ;;  %s1711_s8 = scalar_lea.hbm %s2560_s0, 1024 }
  0xac   : > { %p1712_p11 = scmp.lt.u32.totalorder %s2145_s27, %s2560_s0  ;;  %p1713_p13 = scmp.lt.u32.totalorder %s1711_s8, %s1706_s1 }
  0xad   : > { %p1709_p4 = pnand %p1707_p2, %p2622_p8  ;;  %p1715_p10 = scmp.lt.u32.totalorder %s1706_s1, %s2145_s27 }
  0xae   : > { %p1714_p9 = por %p1713_p13, %p1712_p11 }
  0xaf   : > { %p1710_p0 = pneg %p1709_p4 }
  0xb0   : > { %p1716_p7 = por %p1715_p10, %p1714_p9 }
  0xb2   : > { %p1717_p12 = pnand %p1716_p7, %p1710_p0 }
  0xb4   : > { %1720 = shalt.err (!%p1717_p12)
}
  0xb5   : > { %s1721_s3 = scalar_lea.vmem %s2147_s14, 512  ;;  %s1855_s12 = smov [#allocation2]  }
  0xb6   : > { %p1722_p1 = scmp.ne.s32.totalorder %s2147_s14, %s1721_s3  ;;  %s1726_s20 = sshll.u32 %s1855_s12, 4  ;;  %s1727_s20 = int_to_ptr.vmem [resolvable:$false] %s1726_s20 }
  0xb7   : > { %s1728_s16 = scalar_lea.vmem %s1727_s20, 1024  ;;  %p1729_p5 = scmp.lt.s32.totalorder %s2147_s14, %s1727_s20 }
  0xb8   : > { %p1724_p6 = pnand %p1722_p1, %p2622_p8  ;;  %p1730_p2 = scmp.lt.s32.totalorder %s1728_s16, %s1721_s3 }
  0xba   : > { %p1725_p3 = pneg %p1724_p6  ;;  %p1731_p4 = por %p1730_p2, %p1729_p5 }
  0xbc   : > { %p1732_p11 = pnand %p1731_p4, %p1725_p3 }
  0xbe   : > { %1735 = shalt.err (!%p1732_p11)
}
  0xbf   : > { %p2623_p0 = scmp.ne.s32.totalorder %s2613_s21, 0  ;;  %s1329_s1 = sshll.u32 %s1844_s30, 5 }
  0xc0   : > { %s2181_s8 = scalar_lea.hbm %s2562_s2, %s1329_s1  ;;  %s359_s17 = scalar_lea.vmem [#allocation7], %s1287_s18 }
  0xc1   : > { %1480 = dma.hbm_to_vmem [thread:$0]  (!%p2623_p0), %s2145_s27, 512, %s2147_s14, %s312_s25, %s2621_s23, %s2621_s23, %s2620_s29  }
  0xc2   : > { %s366_s24 = sshll.u32 %s359_s17, 4  ;;  %s1736_s3 = scalar_lea.hbm %s2181_s8, 32  ;;  %s2185_s24 = int_to_ptr.vmem [resolvable:$true] %s366_s24 }
  0xc3   : > { %p1737_p13 = scmp.ne.s32.totalorder %s2181_s8, %s1736_s3  ;;  %s1741_s27 = scalar_lea.hbm %s2562_s2, 64 }
  0xc4   : > { %p1742_p7 = scmp.lt.u32.totalorder %s2181_s8, %s2562_s2  ;;  %p1743_p12 = scmp.lt.u32.totalorder %s1741_s27, %s1736_s3 }
  0xc5   : > { %p1739_p9 = pnand %p1737_p13, %p2622_p8  ;;  %p1745_p6 = scmp.lt.u32.totalorder %s1736_s3, %s2181_s8 }
  0xc6   : > { %p1744_p1 = por %p1743_p12, %p1742_p7 }
  0xc7   : > { %p1740_p10 = pneg %p1739_p9 }
  0xc8   : > { %p1746_p3 = por %p1745_p6, %p1744_p1 }
  0xca   : > { %p1747_p5 = pnand %p1746_p3, %p1740_p10 }
  0xcc   : > { %1750 = shalt.err (!%p1747_p5)
}
  0xcd   : > { %s1751_s15 = scalar_lea.vmem %s2185_s24, 32  ;;  %s1856_s18 = smov [#allocation7]  }
  0xce   : > { %p1752_p2 = scmp.ne.s32.totalorder %s2185_s24, %s1751_s15  ;;  %s1756_s12 = sshll.u32 %s1856_s18, 4  ;;  %s1757_s12 = int_to_ptr.vmem [resolvable:$false] %s1756_s12 }
  0xcf   : > { %s1758_s20 = scalar_lea.vmem %s1757_s12, 64  ;;  %p1759_p13 = scmp.lt.s32.totalorder %s2185_s24, %s1757_s12 }
  0xd0   : > { %p1754_p4 = pnand %p1752_p2, %p2622_p8  ;;  %p1760_p9 = scmp.lt.s32.totalorder %s1758_s20, %s1751_s15 }
  0xd2   : > { %p1755_p11 = pneg %p1754_p4  ;;  %p1761_p7 = por %p1760_p9, %p1759_p13 }
  0xd4   : > { %p1762_p12 = pnand %p1761_p7, %p1755_p11 }
  0xd6   : > { %1765 = shalt.err (!%p1762_p12)
}
  0xd7   : > { %s1857_s16 = smov 16   ;;  %s1858_s1 = smov 1  }
  0xd8   : > { %1486 = dma.hbm_to_vmem [thread:$0]  (!%p2623_p0), %s2181_s8, 32, %s2185_s24, %s2064_s26, %s1857_s16, %s1857_s16, %s1858_s1  }
  0xd9   : > { %p2624_p8 = scmp.ne.s32.totalorder %s2604_s13, 0 }
  0xda   : > { %s2212_s19 = sand.u32 (!%p2624_p8), 1, %s1836_s28   ;;  %p2625_p10 = scmp.ne.s32.totalorder (!%p2624_p8), %s2601_s11, 0 }
  0xdb   : > { %378 = sbr.rel (%p2624_p8) target bundleno = 1000 (0x3e8), region = 52  ;;  %s1291_s22 = sshll.u32 (!%p2624_p8), %s2212_s19, 5 }
  0xdc   : > { %s381_s6 = scalar_lea.sflag (!%p2624_p8), [#allocation3], %s2212_s19  ;;  %s2216_s17 = scalar_lea.vmem (!%p2624_p8), [#allocation2], %s1291_s22 }
  0xe2   : > { %1811 = dma.done.wait (%p2625_p10), %s381_s6, 512  }
  0xe3   : > { %1813 = vsyncadd (%p2625_p10), %s381_s6, 4294966784  ;;  %s389_s13 = sand.u32 1, %s1932_s9   ;;  %s1292_s26 = sshll.u32 %s2212_s19, 4 }
  0xe4   : > { %s390_s21 = scalar_lea.sflag [#allocation6], %s389_s13  ;;  %s2224_s8 = scalar_lea.vmem [#allocation5], %s1292_s26 }
  0xe5   : > { %1815 = dma.done.wait (%p2625_p10), %s390_s21, 288  }
  0xe6   : > { %1817 = vsyncadd (%p2625_p10), %s390_s21, 4294967008  ;;  %s1293_s24 = sshll.u32 %s2212_s19, 1  ;;  %p2626_p0 = scmp.eq.s32.totalorder %s1932_s9, 0 }
  0xe7   : > { %s2231_s3 = scalar_lea.vmem [#allocation7], %s1293_s24 }
  0xe8   : > { %1819 = dma.done.wait (%p2626_p0), [#allocation9], 640   ;;  %p2627_p1 = pmov %p2626_p0 }
  0xe9   : > { %p2628_p6 = pmov %p2626_p0 }
  0xea   : > { %1821 = vsyncadd (%p2627_p1), [#allocation9], 4294966656 }
  0xeb   : > { %1823 = dma.done.wait (%p2628_p6), [#allocation12], 1024   ;;  %p2629_p3 = pmov %p2626_p0 }
  0xec   : > { %v1859_v0 = vmov 0.0   ;;  %vm1860_vm0 = vmmov 0   ;;  %v2247_v1 = vld [vmem:[#allocation8] sm:$0xff]   ;;  %v2250_v2 = vld [vmem:[#allocation8 + $0x8] sm:$0xff]   ;;  %v2253_v3 = vld [vmem:[#allocation8 + $0x10] sm:$0xff]   ;;  %s1861_s11 = smov 1   ;;  %v485_v18 = vlaneseq }
  0xed   : > { %1825 = vsyncadd (%p2629_p3), [#allocation12], 4294966272  ;;  %1360 = vmatprep.subr.bf16.mxu0 %v1859_v0  ;;  %1368 = vmatprep.mubr.msk.bf16.mxu0 %vm1860_vm0, %v1859_v0  ;;  %v2256_v4 = vld [vmem:[%s2216_s17] sm:$0xff]  ;;  %s1862_s29 = smov 2   ;;  %v2265_v5 = vld [vmem:[%s2216_s17 + $0x8] sm:$0xff]  ;;  %vm536_vm1 = vcmask 523264  }
  0xee   : > { %1372 = vmatprep.subr.bf16.mxu1 %v1859_v0  ;;  %1374 = vmatprep.mubr.msk.bf16.mxu1 %vm1860_vm0, %v1859_v0  ;;  %v2268_v6 = vld [vmem:[#allocation8 + $0x18] sm:$0xff]   ;;  %v2274_v7 = vmul.f32 %v2265_v5, %v2265_v5  ;;  %v2281_v8 = vmul.f32 %v2256_v4, %v2256_v4  ;;  %s1863_s23 = smov 127   ;;  %s1864_s27 = smov 126   ;;  %v2309_v11 = vld [vmem:[%s2216_s17 + $0x10] sm:$0xff]  ;;  %v486_v21 = vand.u32 127, %v485_v18  ;;  %vm587_vm6 = vcmask 130048  }
  0xef   : > { %1361 = vmatpush3.bf16.msra.mxu0 %v2247_v1  ;;  %650 = vrot.lane.b32.xlu1 %v2256_v4, %s1861_s11  ;;  %v1553_v9 = vld [vmem:[%s2224_s8] sm:$0xff]   ;;  %v2306_v10 = vld [vmem:[%s2216_s17 + $0x18] sm:$0xff]  ;;  %v2325_v13 = vmul.f32 %v2309_v11, %v2309_v11  ;;  %vm698_vm7 = vcmask 261120   ;;  %s1322_s12 = sshll.u32 %s1932_s9, 4  ;;  %s459_s20 = scalar_lea.vmem [#allocation14], %s2212_s19 }
  0xf0   : > { %1362 = vmatprep.subr.bf16.mxu0 %v1859_v0  ;;  %634 = vrot.lane.b32.xlu0 %v2256_v4, %s1862_s29  ;;  %v2321_v12 = vmul.f32 %v2306_v10, %v2306_v10  ;;  %v2343_v24 = vadd.s32 4294967294, %v486_v21  ;;  %v2345_v25 = vadd.s32 4294967295, %v486_v21  ;;  %v2353_v30 = vadd.s32 1, %v486_v21  ;;  %s1125_s16 = sshll.u32 %s459_s20, 4  ;;  %s2630_s6 = sld [smem:[#allocation28_spill]]  ;;  %s2518_s16 = int_to_ptr.vmem [resolvable:$true] %s1125_s16 }
  0xf1   : > { %v2366_v39 = vadd.s32 2, %v486_v21  ;;  %v2391_v21 = vld [vmem:[#allocation10] sm:$0xff]   ;;  %s1113_s13 = scalar_lea.sflag [#allocation4], %s2212_s19  ;;  %s1766_s26 = scalar_lea.vmem %s2518_s16, 16 }
  0xf2   : > { %vm488_vm2 = vcmp.ge.s32.totalorder %v2343_v24, 0  ;;  %vm492_vm3 = vcmp.ge.s32.totalorder %v2345_v25, 0  ;;  %vm497_vm4 = vcmp.lt.s32.totalorder %v2353_v30, 128  ;;  %p1767_p5 = scmp.ne.s32.totalorder %s2518_s16, %s1766_s26  ;;  %p2631_p2 = scmp.ne.s32.totalorder %s2612_s10, 0 }
  0xf3   : > { %1363 = vmatpush3.bf16.msra.mxu0 %v2250_v2  ;;  %652 = vrot.lane.b32.xlu1 %v2265_v5, %s1861_s11  ;;  %vm501_vm5 = vcmp.lt.s32.totalorder %v2366_v39, 128  ;;  %s1865_s9 = smov [#allocation14]  }
  0xf4   : > { %1364 = vmatprep.subr.bf16.mxu0 %v1859_v0  ;;  %636 = vrot.lane.b32.xlu0 %v2265_v5, %s1862_s29  ;;  %p1768_p4 = pnand %p1767_p5, %p2631_p2  ;;  %s1770_s21 = sshll.u32 %s1865_s9, 4  ;;  %s1771_s21 = int_to_ptr.vmem [resolvable:$false] %s1770_s21 }
  0xf5   : > { %p1773_p13 = scmp.lt.s32.totalorder %s2518_s16, %s1771_s21 }
  0xf6   : > { %s2516_s17 = scalar_lea.hbm %s2630_s6, %s1322_s12  ;;  %p1769_p11 = pneg %p1768_p4 }
  0xf7   : > { %1365 = vmatpush3.bf16.msra.mxu0 %v2253_v3  ;;  %640 = vrot.lane.b32.xlu1 %v2274_v7, %s1862_s29 }
  0xf8   : > { %1366 = vmatprep.subr.bf16.mxu0 %v1859_v0  ;;  %638 = vrot.lane.b32.xlu0 %v2281_v8, %s1862_s29 }
  0xfb   : > { %1367 = vmatpush3.bf16.msra.mxu0 %v2268_v6  ;;  %668 = vrot.lane.b32.xlu1 %v2265_v5, %s1863_s23 }
  0xfc   : > { %1404 = vmatprep.subr.bf16.mxu0 %v1859_v0  ;;  %666 = vrot.lane.b32.xlu0 %v2256_v4, %s1863_s23 }
  0xfe   : > { %1369 = vmatmul.mubr.msk.bf16.vlgmr.msra.gmra.mrb[0].mxu0 %vm536_vm1, %v1553_v9 }
  0xff   : > { %1406 = vmatprep.mubr.msk.bf16.mxu0 %vm1860_vm0, %v1859_v0  ;;  %656 = vrot.lane.b32.xlu1 %v2274_v7, %s1861_s11 }
 0x100   : > { %654 = vrot.lane.b32.xlu0 %v2281_v8, %s1861_s11 }
 0x103   : > { %684 = vrot.lane.b32.xlu1 %v2265_v5, %s1864_s27 }
 0x104   : > { %682 = vrot.lane.b32.xlu0 %v2256_v4, %s1864_s27 }
 0x107   : > { %672 = vrot.lane.b32.xlu1 %v2274_v7, %s1863_s23 }
 0x108   : > { %670 = vrot.lane.b32.xlu0 %v2281_v8, %s1863_s23 }
 0x10b   : > { %688 = vrot.lane.b32.xlu1 %v2274_v7, %s1864_s27 }
 0x10c   : > { %686 = vrot.lane.b32.xlu0 %v2281_v8, %s1864_s27 }
 0x10f   : > { %930 = vrot.lane.b32.xlu1 %v2306_v10, %s1862_s29 }
 0x110   : > { %928 = vrot.lane.b32.xlu0 %v2309_v11, %s1862_s29 }
 0x113   : > { %946 = vrot.lane.b32.xlu1 %v2306_v10, %s1861_s11 }
 0x114   : > { %944 = vrot.lane.b32.xlu0 %v2309_v11, %s1861_s11 }
 0x117   : > { %934 = vrot.lane.b32.xlu1 %v2321_v12, %s1862_s29 }
 0x118   : > { %932 = vrot.lane.b32.xlu0 %v2325_v13, %s1862_s29 }
 0x11b   : > { %962 = vrot.lane.b32.xlu1 %v2306_v10, %s1863_s23 }
 0x11c   : > { %960 = vrot.lane.b32.xlu0 %v2309_v11, %s1863_s23 }
 0x11f   : > { %950 = vrot.lane.b32.xlu1 %v2321_v12, %s1861_s11 }
 0x120   : > { %948 = vrot.lane.b32.xlu0 %v2325_v13, %s1861_s11 }
 0x123   : > { %978 = vrot.lane.b32.xlu1 %v2306_v10, %s1864_s27 }
 0x124   : > { %976 = vrot.lane.b32.xlu0 %v2309_v11, %s1864_s27 }
 0x127   : > { %966 = vrot.lane.b32.xlu1 %v2321_v12, %s1863_s23 }
 0x128   : > { %964 = vrot.lane.b32.xlu0 %v2325_v13, %s1863_s23 }
 0x12b   : > { %982 = vrot.lane.b32.xlu1 %v2321_v12, %s1864_s27 }
 0x12c   : > { %980 = vrot.lane.b32.xlu0 %v2325_v13, %s1864_s27 }
 0x161   : > { %v651_v14 = vpop.permute.xlu1 %650 }
 0x162   : > { %v635_v15 = vpop.permute.xlu0 %634  ;;  %v658_v35 = vsel %vm492_vm3, %v651_v14, 0.0 }
 0x163   : > { %v642_v28 = vsel %vm488_vm2, %v635_v15, 0.0 }
 0x164   : > { %v646_v31 = vadd.f32 %v642_v28, %v2256_v4  ;;  %v2409_v28 = vld [vmem:[#allocation11 + $0x18] sm:$0xff] }
 0x165   : > { %v653_v16 = vpop.permute.xlu1 %652 }
 0x166   : > { %v637_v17 = vpop.permute.xlu0 %636  ;;  %v659_v36 = vsel %vm492_vm3, %v653_v16, 0.0  ;;  %v662_v43 = vadd.f32 %v658_v35, %v646_v31 }
 0x167   : > { %v643_v29 = vsel %vm488_vm2, %v637_v17, 0.0 }
 0x168   : > { %v647_v32 = vadd.f32 %v643_v29, %v2265_v5 }
 0x169   : > { %v641_v19 = vpop.permute.xlu1 %640 }
 0x16a   : > { %v639_v20 = vpop.permute.xlu0 %638  ;;  %v645_v37 = vsel %vm488_vm2, %v641_v19, 0.0  ;;  %v663_v42 = vadd.f32 %v659_v36, %v647_v32 }
 0x16b   : > { %v644_v38 = vsel %vm488_vm2, %v639_v20, 0.0  ;;  %v649_v40 = vadd.f32 %v645_v37, %v2274_v7 }
 0x16c   : > { %v648_v41 = vadd.f32 %v644_v38, %v2281_v8 }
 0x16d   : > { %v669_v22 = vpop.permute.xlu1 %668 }
 0x16e   : > { %v667_v23 = vpop.permute.xlu0 %666  ;;  %v675_v46 = vsel %vm497_vm4, %v669_v22, 0.0  ;;  %v2393_v22 = vld [vmem:[#allocation11] sm:$0xff] }
 0x16f   : > { %v674_v47 = vsel %vm497_vm4, %v667_v23, 0.0  ;;  %v679_v50 = vadd.f32 %v675_v46, %v663_v42  ;;  %v2427_v42 = vld [vmem:[#allocation13 + $0x8] sm:$0xff] }
 0x170   : > { %v678_v51 = vadd.f32 %v674_v47, %v662_v43 }
 0x171   : > { %v657_v26 = vpop.permute.xlu1 %656 }
 0x172   : > { %v655_v27 = vpop.permute.xlu0 %654  ;;  %v661_v48 = vsel %vm492_vm3, %v657_v26, 0.0  ;;  %v2399_v26 = vld [vmem:[#allocation11 + $0x8] sm:$0xff] }
 0x173   : > { %v660_v49 = vsel %vm492_vm3, %v655_v27, 0.0  ;;  %v665_v52 = vadd.f32 %v661_v48, %v649_v40  ;;  %v2402_v27 = vld [vmem:[#allocation11 + $0x10] sm:$0xff] }
 0x174   : > { %v664_v53 = vadd.f32 %v660_v49, %v648_v41 }
 0x175   : > { %v685_v33 = vpop.permute.xlu1 %684 }
 0x176   : > { %v683_v34 = vpop.permute.xlu0 %682  ;;  %v691_v54 = vsel %vm501_vm5, %v685_v33, 0.0 }
 0x177   : > { %v690_v55 = vsel %vm501_vm5, %v683_v34, 0.0  ;;  %v695_v60 = vadd.f32 %v691_v54, %v679_v50 }
 0x178   : > { %v694_v61 = vadd.f32 %v690_v55, %v678_v51 }
 0x179   : > { %v673_v44 = vpop.permute.xlu1 %672 }
 0x17a   : > { %v671_v45 = vpop.permute.xlu0 %670  ;;  %v677_v56 = vsel %vm497_vm4, %v673_v44, 0.0  ;;  %v1424_v18 = vpack.c.bf16 %v695_v60, %v694_v61 }
 0x17b   : > { %v676_v57 = vsel %vm497_vm4, %v671_v45, 0.0  ;;  %v681_v62 = vadd.f32 %v677_v56, %v665_v52 }
 0x17c   : > { %v680_v63 = vadd.f32 %v676_v57, %v664_v53 }
 0x17d   : > { %v689_v58 = vpop.permute.xlu1 %688 }
 0x17e   : > { %v687_v59 = vpop.permute.xlu0 %686  ;;  %v693_v8 = vsel %vm501_vm5, %v689_v58, 0.0  ;;  %v2451_v58 = vld [vmem:[#allocation13 + $0x18] sm:$0xff] }
 0x17f   : > { %v692_v9 = vsel %vm501_vm5, %v687_v59, 0.0  ;;  %v697_v19 = vadd.f32 %v693_v8, %v681_v62  ;;  %v2455_v62 = vld [vmem:[#allocation13 + $0x10] sm:$0xff] }
 0x180   : > { %v696_v20 = vadd.f32 %v692_v9, %v680_v63 }
 0x181   : > { %v931_v29 = vpop.permute.xlu1 %930 }
 0x182   : > { %v1428_v23 = vpack.c.bf16 %v697_v19, %v696_v20  ;;  %v929_v31 = vpop.permute.xlu0 %928  ;;  %v937_v43 = vsel %vm488_vm2, %v931_v29, 0.0 }
 0x183   : > { %v936_v44 = vsel %vm488_vm2, %v929_v31, 0.0  ;;  %v941_v51 = vadd.f32 %v2306_v10, %v937_v43 }
 0x184   : > { %v940_v52 = vadd.f32 %v2309_v11, %v936_v44 }
 0x185   : > { %v947_v32 = vpop.permute.xlu1 %946 }
 0x186   : > { %v945_v33 = vpop.permute.xlu0 %944  ;;  %v953_v54 = vsel %vm492_vm3, %v947_v32, 0.0 }
 0x187   : > { %v952_v55 = vsel %vm492_vm3, %v945_v33, 0.0  ;;  %v957_v8 = vadd.f32 %v953_v54, %v941_v51 }
 0x188   : > { %v956_v9 = vadd.f32 %v952_v55, %v940_v52 }
 0x189   : > { %v935_v34 = vpop.permute.xlu1 %934 }
 0x18a   : > { %v939_v56 = vsel %vm488_vm2, %v935_v34, 0.0 }
 0x18d   : > { %v963_v35 = vpop.permute.xlu1 %962 }
 0x1d1   : > { %v574_v7 = vpop.f32.mrb[0].mxu0 }
 0x1d2   : > { %v1370_v14 = vpop.f32.mrb[1].mxu0 }
 0x1d3   : > { %v577_v15 = vpop.f32.mrb[2].mxu0  ;;  %v943_v14 = vadd.f32 %v939_v56, %v2321_v12 }
 0x1d4   : > { %v581_v16 = vpack.c.bf16 %v577_v15, %v574_v7  ;;  %v1371_v17 = vpop.f32.mrb[3].mxu0 }
 0x1d5   : > { %v969_v17 = vsel %vm497_vm4, %v963_v35, 0.0 }
 0x1d6   : > { %1373 = vmatpush3.bf16.msra.mxu1 %v581_v16  ;;  %v973_v31 = vadd.f32 %v969_v17, %v957_v8 }
 0x1d7   : > { %1425 = vmatprep.subr.bf16.mxu1 %v1424_v18 }
 0x1d9   : > { %1375 = vmatmul.mubr.msk.bf16.vlgmr.msra.gmra.mrb[0].mxu1 %vm587_vm6, %v2391_v21 }
 0x1da   : > { %1427 = vmatpush3.bf16.msra.mxu1 %v1424_v18  ;;  %1386 = vmatprep.mubr.msk.f32.mxu1 %vm698_vm7, %v2393_v22 }
 0x1db   : > { %1429 = vmatprep.subr.bf16.mxu1 %v1428_v23 }
 0x1de   : > { %1431 = vmatpush3.bf16.msra.mxu1 %v1428_v23 }
 0x1df   : > { %1392 = vmatprep.subr.bf16.mxu1 %v1859_v0 }
 0x1e1   : > { %1387 = vmatmul.mubr.msk.f32.vlgmr.msra.gmra.mrb[4].mxu1 %vm698_vm7, %v2399_v26 }
 0x1e2   : > { %1393 = vmatpush3.bf16.msra.mxu1 %v2247_v1  ;;  %1389 = vmatprep.mubr.msk.f32.mxu1 %vm698_vm7, %v2402_v27  ;;  %v1555_v1 = vld [vmem:[%s2224_s8 + $0x8] sm:$0xff]   ;;  %s1772_s8 = scalar_lea.vmem %s1771_s21, 32 }
 0x1e3   : > { %1394 = vmatprep.subr.bf16.mxu1 %v1859_v0  ;;  %p1774_p9 = scmp.lt.s32.totalorder %s1772_s8, %s1766_s26 }
 0x1e5   : > { %1390 = vmatmul.mubr.msk.f32.gmra.mrb[6].mxu1 %vm698_vm7, %v2409_v28  ;;  %p1775_p7 = por %p1774_p9, %p1773_p13 }
 0x1e6   : > { %1395 = vmatpush3.bf16.msra.mxu1 %v2250_v2  ;;  %1400 = vmatprep.mubr.msk.bf16.mxu1 %vm1860_vm0, %v1859_v0  ;;  %v933_v2 = vpop.permute.xlu0 %932 }
 0x1e7   : > { %1396 = vmatprep.subr.bf16.mxu1 %v1859_v0  ;;  %v938_v60 = vsel %vm488_vm2, %v933_v2, 0.0  ;;  %p1776_p12 = pnand %p1775_p7, %p1769_p11 }
 0x1e8   : > { %v942_v16 = vadd.f32 %v938_v60, %v2325_v13 }
 0x1ea   : > { %1397 = vmatpush3.bf16.msra.mxu1 %v2253_v3  ;;  %v961_v36 = vpop.permute.xlu0 %960 }
 0x1eb   : > { %1398 = vmatprep.subr.bf16.mxu1 %v1859_v0  ;;  %v951_v0 = vpop.permute.xlu1 %950  ;;  %v968_v24 = vsel %vm497_vm4, %v961_v36, 0.0 }
 0x1ec   : > { %v955_v23 = vsel %vm492_vm3, %v951_v0, 0.0  ;;  %v972_v13 = vadd.f32 %v968_v24, %v956_v9 }
 0x1ed   : > { %v959_v33 = vadd.f32 %v955_v23, %v943_v14 }
 0x1ee   : > { %1399 = vmatpush3.bf16.msra.mxu1 %v2268_v6  ;;  %v949_v41 = vpop.permute.xlu0 %948  ;;  %v2429_v6 = vld [vmem:[#allocation13] sm:$0xff] }
 0x1ef   : > { %v979_v49 = vpop.permute.xlu1 %978  ;;  %v954_v12 = vsel %vm492_vm3, %v949_v41, 0.0 }
 0x1f0   : > { %v958_v34 = vadd.f32 %v954_v12, %v942_v16  ;;  %v985_v2 = vsel %vm501_vm5, %v979_v49, 0.0 }
 0x1f1   : > { %1401 = vmatmul.mubr.msk.bf16.vlgmr.msra.gmra.mrb[8].mxu1 %vm536_vm1, %v1555_v1  ;;  %v989_v41 = vadd.f32 %v985_v2, %v973_v31 }
 0x1f2   : > { %v977_v50 = vpop.permute.xlu0 %976 }
 0x1f3   : > { %v967_v19 = vpop.permute.xlu1 %966  ;;  %v984_v36 = vsel %vm501_vm5, %v977_v50, 0.0 }
 0x1f4   : > { %v988_v43 = vadd.f32 %v984_v36, %v972_v13 }
 0x1f6   : > { %v965_v20 = vpop.permute.xlu0 %964  ;;  %v1432_v30 = vpack.c.bf16 %v989_v41, %v988_v43 }
 0x1f7   : > { %v970_v25 = vsel %vm497_vm4, %v965_v20, 0.0 }
 0x1fa   : > { %v981_v0 = vpop.permute.xlu0 %980 }
 0x1fb   : > { %v986_v50 = vsel %vm501_vm5, %v981_v0, 0.0 }
 0x2ac   : > { %v2423_v37 = vpop.f32.mrb[0].mxu1 }
 0x2ad   : > { %v1376_v38 = vpop.f32.mrb[1].mxu1 }
 0x2ae   : > { %v2425_v40 = vpop.f32.mrb[2].mxu1  ;;  %v971_v38 = vsel %vm497_vm4, %v967_v19, 0.0 }
 0x2af   : > { %v1377_v3 = vpop.f32.mrb[3].mxu1  ;;  %v975_v44 = vadd.f32 %v971_v38, %v959_v33 }
 0x2b0   : > { %v983_v3 = vpop.permute.xlu1 %982 }
 0x2b1   : > { %v987_v49 = vsel %vm501_vm5, %v983_v3, 0.0 }
 0x2b2   : > { %v991_v55 = vadd.f32 %v987_v49, %v975_v44 }
 0x2b4   : > { %v1388_v45 = vpop.f32.mrb[4].mxu1 }
 0x2b5   : > { %v2436_v46 = vmul.f32 %v1388_v45, %v2427_v42  ;;  %v777_v47 = vpop.f32.mrb[5].mxu1 }
 0x2b6   : > { %v2439_v48 = vmul.f32 %v777_v47, %v2429_v6 }
 0x2b7   : > { %v799_v53 = vmul.f32 %v1388_v45, %v2436_v46  ;;  %v974_v45 = vadd.f32 %v970_v25, %v958_v34  ;;  %v807_v39 = vsub.f32 %v2265_v5, %v2436_v46 }
 0x2b8   : > { %v798_v57 = vmul.f32 %v2439_v48, %v777_v47  ;;  %v1391_v59 = vpop.f32.mrb[6].mxu1 }
 0x2b9   : > { %v801_v61 = vsub.f32 %v1391_v59, %v799_v53  ;;  %v787_v63 = vpop.f32.mrb[7].mxu1  ;;  %v990_v56 = vadd.f32 %v986_v50, %v974_v45  ;;  %v474_v59 = vld [vmem:[%s2565_s5] sm:$0xff] }
 0x2ba   : > { %v800_v7 = vsub.f32 %v787_v63, %v798_v57  ;;  %v475_v57 = vld [vmem:[%s2565_s5 + $0x8] sm:$0xff]  ;;  %v626_v14 = vadd.f32 %v2423_v37, %v474_v59 }
 0x2bb   : > { %v803_v15 = vmul.f32 %v801_v61, %v2451_v58  ;;  %v806_v61 = vsub.f32 %v2256_v4, %v2439_v48  ;;  %v1436_v9 = vpack.c.bf16 %v991_v55, %v990_v56  ;;  %v826_v55 = vld [vmem:[%s2231_s3] sm:$0x1]  ;;  %v1321_v56 = vld [vmem:[%s2231_s3 + $0x1] sm:$0x1] }
 0x2bc   : > { %v802_v18 = vmul.f32 %v800_v7, %v2455_v62  ;;  %v629_v7 = vadd.f32 %v2425_v40, %v475_v57 }
 0x2bd   : > { %v805_v1 = vmax.f32 %v803_v15, 0.0 }
 0x2be   : > { %v804_v29 = vmax.f32 %v802_v18, 0.0 }
 0x2bf   : > { %v809_v32 = vadd.f32 1e-06, %v805_v1 }
 0x2c0   : > { %v808_v35 = vadd.f32 1e-06, %v804_v29 }
 0x2c1   : > { %1556 = vrsqrt.f32 %v809_v32 }
 0x2c2   : > { %1558 = vrsqrt.f32 %v808_v35 }
 0x2c4   : > { %v877_v47 = vpop.f32.mrb[8].mxu1 }
 0x2c5   : > { %v1402_v51 = vpop.f32.mrb[9].mxu1 }
 0x2c6   : > { %v880_v52 = vpop.f32.mrb[10].mxu1 }
 0x2c7   : > { %v884_v53 = vpack.c.bf16 %v880_v52, %v877_v47  ;;  %v1403_v54 = vpop.f32.mrb[11].mxu1 }
 0x2c9   : > { %1405 = vmatpush3.bf16.msra.mxu0 %v884_v53 }
 0x2ca   : > { %1433 = vmatprep.subr.bf16.mxu0 %v1432_v30 }
 0x2cb   : > { %v1557_v60 = vpop.eup %1556 }
 0x2cc   : > { %v1559_v63 = vpop.eup %1558  ;;  %v813_v8 = vmul.f32 %v1557_v60, %v807_v39  ;;  %1407 = vmatmul.mubr.msk.bf16.vlgmr.msra.gmra.mrb[4].mxu0 %vm587_vm6, %v2391_v21 }
 0x2cd   : > { %v812_v15 = vmul.f32 %v1559_v63, %v806_v61  ;;  %1435 = vmatpush3.bf16.msra.mxu0 %v1432_v30  ;;  %1418 = vmatprep.mubr.msk.f32.mxu0 %vm698_vm7, %v2393_v22 }
 0x2ce   : > { %v815_v5 = vsub.f32 %v813_v8, %v629_v7  ;;  %1437 = vmatprep.subr.bf16.mxu0 %v1436_v9 }
 0x2cf   : > { %v814_v46 = vsub.f32 %v812_v15, %v626_v14 }
 0x2d0   : > { %v817_v16 = vmul.f32 %v815_v5, %v815_v5 }
 0x2d1   : > { %v816_v4 = vmul.f32 %v814_v46, %v814_v46  ;;  %1439 = vmatpush3.bf16.msra.mxu0 %v1436_v9 }
 0x2d3   : > { %v818_v48 = vadd.f32 %v817_v16, %v816_v4 }
 0x2d4   : > { %1419 = vmatmul.mubr.msk.f32.vlgmr.msra.gmra.mrb[8].mxu0 %vm698_vm7, %v2399_v26 }
 0x2d5   : > { %1421 = vmatprep.mubr.msk.f32.mxu0 %vm698_vm7, %v2402_v27 }
 0x2d8   : > { %1422 = vmatmul.mubr.msk.f32.gmra.mrb[10].mxu0 %vm698_vm7, %v2409_v28 }
 0x39f   : > { %v919_v21 = vpop.f32.mrb[4].mxu0 }
 0x3a0   : > { %v1408_v37 = vpop.f32.mrb[5].mxu0  ;;  %v920_v3 = vadd.f32 %v919_v21, %v474_v59 }
 0x3a1   : > { %v922_v40 = vpop.f32.mrb[6].mxu0 }
 0x3a2   : > { %v1409_v22 = vpop.f32.mrb[7].mxu0  ;;  %v923_v38 = vadd.f32 %v922_v40, %v475_v57 }
 0x3a7   : > { %v1420_v17 = vpop.f32.mrb[8].mxu0 }
 0x3a8   : > { %v1078_v24 = vmul.f32 %v1420_v17, %v2427_v42  ;;  %v1058_v18 = vpop.f32.mrb[9].mxu0  ;;  %v819_v42 = vrot.slane %v818_v48, 4 }
 0x3a9   : > { %v1077_v19 = vmul.f32 %v1058_v18, %v2429_v6 }
 0x3aa   : > { %v1080_v20 = vmul.f32 %v1420_v17, %v1078_v24  ;;  %v1088_v34 = vsub.f32 %v2306_v10, %v1078_v24  ;;  %v820_v35 = vadd.f32 %v819_v42, %v818_v48 }
 0x3ab   : > { %v1079_v23 = vmul.f32 %v1077_v19, %v1058_v18  ;;  %v1423_v12 = vpop.f32.mrb[10].mxu0  ;;  %v1087_v2 = vsub.f32 %v2309_v11, %v1077_v19 }
 0x3ac   : > { %v1082_v26 = vsub.f32 %v1423_v12, %v1080_v20  ;;  %v1068_v1 = vpop.f32.mrb[11].mxu0  ;;  %v821_v41 = vrot.slane %v820_v35, 2 }
 0x3ad   : > { %v1081_v29 = vsub.f32 %v1068_v1, %v1079_v23 }
 0x3ae   : > { %v1084_v27 = vmul.f32 %v1082_v26, %v2451_v58  ;;  %v822_v10 = vadd.f32 %v821_v41, %v820_v35 }
 0x3af   : > { %v1083_v28 = vmul.f32 %v1081_v29, %v2455_v62 }
 0x3b0   : > { %v1086_v31 = vmax.f32 %v1084_v27, 0.0  ;;  %v823_v49 = vrot.slane %v822_v10, 1 }
 0x3b1   : > { %v1085_v13 = vmax.f32 %v1083_v28, 0.0 }
 0x3b2   : > { %v1090_v32 = vadd.f32 1e-06, %v1086_v31  ;;  %v824_v51 = vadd.f32 %v823_v49, %v822_v10 }
 0x3b3   : > { %v1089_v33 = vadd.f32 1e-06, %v1085_v13 }
 0x3b4   : > { %1560 = vrsqrt.f32 %v1090_v32  ;;  %v825_v54 = vmul.f32 0.0625, %v824_v51 }
 0x3b5   : > { %1562 = vrsqrt.f32 %v1089_v33 }
 0x3b6   : > { %v827_v59 = vmul.f32 %v826_v55, %v825_v54 }
 0x3be   : > { %v1561_v6 = vpop.eup %1560 }
 0x3bf   : > { %v1563_v36 = vpop.eup %1562  ;;  %v1094_v25 = vmul.f32 %v1561_v6, %v1088_v34 }
 0x3c0   : > { %v1093_v58 = vmul.f32 %v1563_v36, %v1087_v2 }
 0x3c1   : > { %v1096_v0 = vsub.f32 %v1094_v25, %v923_v38 }
 0x3c2   : > { %v1095_v62 = vsub.f32 %v1093_v58, %v920_v3 }
 0x3c3   : > { %v1098_v43 = vmul.f32 %v1096_v0, %v1096_v0 }
 0x3c4   : > { %v1097_v44 = vmul.f32 %v1095_v62, %v1095_v62 }
 0x3c6   : > { %v1099_v45 = vadd.f32 %v1098_v43, %v1097_v44 }
 0x3c8   : > { %v1100_v47 = vrot.slane %v1099_v45, 4 }
 0x3ca   : > { %v1101_v11 = vadd.f32 %v1100_v47, %v1099_v45 }
 0x3cc   : > { %v1102_v50 = vrot.slane %v1101_v11, 2 }
 0x3ce   : > { %v1103_v52 = vadd.f32 %v1102_v50, %v1101_v11 }
 0x3d0   : > { %v1104_v53 = vrot.slane %v1103_v52, 1 }
 0x3d2   : > { %v1105_v30 = vadd.f32 %v1104_v53, %v1103_v52 }
 0x3d4   : > { %v1106_v57 = vmul.f32 0.0625, %v1105_v30 }
 0x3d6   : > { %v1109_v39 = vmul.f32 %v1321_v56, %v1106_v57 }
 0x3d8   : > { %v1110_v60 = vadd.f32 %v1109_v39, %v827_v59 }
 0x3da   : > { %1111 = vst [vmem:[%s459_s20] sm:$0x1] %v1110_v60 }
 0x3db   : > { %1779 = shalt.err (!%p1776_p12)
}
 0x3dc   : > { %s1780_s19 = scalar_lea.hbm %s2516_s17, 16  ;;  %s1784_s11 = scalar_lea.hbm %s2630_s6, 32 }
 0x3dd   : > { %p1781_p8 = scmp.ne.s32.totalorder %s2516_s17, %s1780_s19  ;;  %p1785_p1 = scmp.lt.u32.totalorder %s2516_s17, %s2630_s6 }
 0x3de   : > { %p1786_p6 = scmp.lt.u32.totalorder %s1784_s11, %s1780_s19  ;;  %p1788_p5 = scmp.lt.u32.totalorder %s1780_s19, %s2516_s17 }
 0x3df   : > { %p1782_p10 = pnand %p1781_p8, %p2631_p2 }
 0x3e0   : > { %p1787_p3 = por %p1786_p6, %p1785_p1 }
 0x3e1   : > { %p1783_p0 = pneg %p1782_p10 }
 0x3e2   : > { %p1789_p4 = por %p1788_p5, %p1787_p3 }
 0x3e4   : > { %p1790_p11 = pnand %p1789_p4, %p1783_p0 }
 0x3e6   : > { %1793 = shalt.err (!%p1790_p11)
}
 0x3e7   : > { %1462 = dma.vmem_to_hbm [thread:$0]  (%p2631_p2), %s2518_s16, 16, %s2516_s17, %s1113_s13  }
 0x3e8 PF: > { %s2632_s27 = sld [smem:[#allocation20_spill]]  ;;  %s2633_s14 = sld [smem:[#allocation22_spill]] }
 0x3e9   : > { %p2635_p9 = scmp.ge.s32.totalorder %s1844_s30, 2 }
 0x3ee   : > { %s1137_s25 = sand.u32 1, %s2632_s27   ;;  %p2634_p13 = scmp.ne.s32.totalorder %s2633_s14, 0 }
 0x3ef   : > { %s1138_s15 = scalar_lea.sflag [#allocation4], %s1137_s25 }
 0x3f0   : > { %p1488_p7 = pnand %p2635_p9, %p2634_p13 }
 0x3f2   : > { %1827 = dma.done.wait (!%p1488_p7), %s1138_s15, 16  }
 0x3f3   : > { %1829 = vsyncadd (!%p1488_p7), %s1138_s15, 4294967280  ;;  %s2636_s30 = sld [smem:[#allocation23_spill]]  ;;  %s2637_s18 = sld [smem:[#allocation21_spill]] }
 0x3f4   : > { %s2638_s29 = sld [smem:[#allocation24_spill]]  ;;  %s2639_s27 = smov %s1836_s28 }
 0x3f9   : > { %p26_p12 = scmp.ge.s32.totalorder %s2636_s30, 4   ;;  %s2640_s28 = smov %s2637_s18 }
 0x3fb   :  { %28 = sbr.rel (!%p26_p12) target bundleno = 14 (0xe), region = 141 }
 0x402   :  { %1142 = vsyncpa [#allocation3], 1 }
 0x403   :  { %1144 = vsyncpa [#allocation3 + $0x1], 1 }
 0x404   :  { %1145 = vsyncpa [#allocation6], 1 }
 0x405   :  { %1147 = vsyncpa [#allocation6 + $0x1], 1 }
 0x406   :  { %1148 = vsyncpa [#allocation9], 1 }
 0x407   :  { %1149 = vsyncpa [#allocation12], 1 }
 0x408   :  { %1150 = vsyncpa [#allocation4], 1 }
 0x409   :  { %1152 = vsyncpa [#allocation4 + $0x1], 1 }

</bundles_post_ra>
